<compile_context>
chip_gen: v7x
topology: tpu7x:2x2x1
jax: 0.10.0
libtpu: 0.0.40
codegen_flags: <defaults>
</compile_context>

<pallas_src>
import functools

import jax
import jax.numpy as jnp
from jax.experimental import pallas as pl
from jax.experimental.pallas import tpu as pltpu


def pam_kernel(q_ref, k_ref, v_ref, x_ref, gamma_ref, o_ref,
               acc_scr, m_scr, l_scr, *, tk, nk):
    """One (batch, query-tile) grid step: flash-style attention over key chunks.

    q_ref:  (1, C8, TQ)  query tile           (compute dtype)
    k_ref:  (1, C8, N)   keys,   per-batch resident (compute dtype)
    v_ref:  (1, C,  N)   values, per-batch resident (compute dtype)
    x_ref:  (1, C,  TQ)  residual tile        (f32, exact skip connection)
    o_ref:  (1, C,  TQ)  output tile          (f32)
    acc_scr: (C, TQ) f32   unnormalized attention output accumulator
    m_scr / l_scr: (1, TQ) f32   running max / running sum (online softmax)
    """
    q = q_ref[0]                                       # (C8, TQ)

    m_scr[...] = jnp.full_like(m_scr, -jnp.inf)
    l_scr[...] = jnp.zeros_like(l_scr)
    acc_scr[...] = jnp.zeros_like(acc_scr)

    def body(kc, carry):
        start = pl.multiple_of(kc * tk, tk)
        k_c = k_ref[0, :, pl.ds(start, tk)]            # (C8, TK)
        v_c = v_ref[0, :, pl.ds(start, tk)]            # (C,  TK)

        # s_T[j, i] = <k_j, q_i>  -> (TK, TQ); dim-0 contraction still lowers to MXU.
        s_t = jax.lax.dot_general(
            k_c, q, dimension_numbers=(((0,), (0,)), ((), ())),
            preferred_element_type=jnp.float32)        # (TK, TQ) f32

        m_prev = m_scr[...]                            # (1, TQ)
        m_new = jnp.maximum(m_prev, jnp.max(s_t, axis=0, keepdims=True))
        alpha = jnp.exp(m_prev - m_new)                # (1, TQ)  rescale factor
        p_t = jnp.exp(s_t - m_new)                     # (TK, TQ) f32, UNNORMALIZED

        l_scr[...] = alpha * l_scr[...] + jnp.sum(p_t, axis=0, keepdims=True)
        # out[c, i] += sum_j v[c, j] * p_T[j, i] -> plain (C, TK) @ (TK, TQ) matmul.
        acc_scr[...] = alpha * acc_scr[...] + jnp.dot(
            v_c, p_t.astype(v_c.dtype), preferred_element_type=jnp.float32)
        m_scr[...] = m_new
        return carry

    jax.lax.fori_loop(0, nk, body, 0, unroll=(nk <= 8))

    # Deferred softmax normalization: fold gamma into the (1, TQ) reciprocal row and
    # scale the (C, TQ) accumulator once (C*TQ mults instead of TQ*N).
    scale = gamma_ref[0] * pl.reciprocal(l_scr[...], approx=False)   # (1, TQ)
    o_ref[0] = acc_scr[...] * scale + x_ref[0]


def _pick_tile(n, max_tile):
    """Largest multiple of 128 dividing n (capped at max_tile); else n itself."""
    if n % 128 != 0:
        return n
    best = 128
    t = 128
    while t <= min(max_tile, n):
        if n % t == 0:
            best = t
        t += 128
    return best


def pam_module_forward(x_nchw, wq, bq, wk, bk, wv, bv, gamma,
                       *, q_tile=None, k_tile=None, compute_dtype=jnp.bfloat16):
    """PAM_Module.forward.

    x_nchw: (B, C, H, W) f32;  wq/wk: (C//8, C);  bq/bk: (C//8,);
    wv: (C, C);  bv: (C,);  gamma: scalar.  Returns (B, C, H, W) f32.

    compute_dtype: MXU-operand dtype for Q/K/V (default bf16; accumulation, softmax
    and the residual skip-connection stay in f32 on every generation).
    """
    B, C, H, W = x_nchw.shape
    N = H * W
    C8 = wq.shape[0]
    cdt = jnp.dtype(compute_dtype)

    # Query tile capped at 256 (v7x-safe); key chunk capped at 512.
    TQ = int(q_tile) if q_tile is not None else _pick_tile(N, 256)
    TK = int(k_tile) if k_tile is not None else _pick_tile(N, 512)
    assert N % TQ == 0, f"q_tile={TQ} must divide N={N}"
    assert N % TK == 0, f"k_tile={TK} must divide N={N}"
    NT = N // TQ
    NK = N // TK

    # NCHW -> (B, C, N) is a pure reshape.  The residual stays f32 (exact skip).
    x_cn = x_nchw.reshape(B, C, N).astype(jnp.float32)
    xc = x_cn.astype(cdt)

    # Hoisted 1x1-conv projections: batched XLA matmuls (full MXU efficiency, f32
    # accumulation), results cast to the kernel's MXU-feed dtype.
    def proj(w, b):
        y = jnp.einsum('oc,bcn->bon', w.astype(cdt), xc,
                       preferred_element_type=jnp.float32)
        return (y + b.astype(jnp.float32)[None, :, None]).astype(cdt)

    q = proj(wq, bq)     # (B, C8, N)
    k = proj(wk, bk)     # (B, C8, N)
    v = proj(wv, bv)     # (B, C,  N)
    gamma1 = jnp.asarray(gamma, jnp.float32).reshape((1,))

    # Generation-aware scoped-VMEM budget (never request more than ~0.85 * physical).
    isz = cdt.itemsize
    est = (2 * C8 * TQ * isz            # q tile (double buffered)
           + 2 * (C8 + C) * N * isz     # K, V per-batch resident (2 bufs each)
           + 4 * C * TQ * 4             # x residual + out tiles (f32, 2 bufs each)
           + C * TQ * 4 + 2 * TQ * 4    # acc / m / l scratch
           + 2 * TK * TQ * 4)           # s_t / p_t slabs (f32)
    try:
        cap = int(pltpu.get_tpu_info().vmem_capacity_bytes)
    except Exception:
        cap = 64 * 2**20                # conservative fallback (v7x per-TC VMEM)
    vmem_limit = int(min(int(0.85 * cap), max(32 * 2**20, 2 * est)))

    kernel = functools.partial(pam_kernel, tk=TK, nk=NK)

    out_cn = pl.pallas_call(
        kernel,
        out_shape=jax.ShapeDtypeStruct((B, C, N), jnp.float32),
        grid_spec=pltpu.PrefetchScalarGridSpec(
            num_scalar_prefetch=0,
            grid=(B, NT),
            in_specs=[
                pl.BlockSpec((1, C8, TQ), lambda b, t: (b, 0, t)),   # q tile
                pl.BlockSpec((1, C8, N),  lambda b, t: (b, 0, 0)),   # K (per-batch resident)
                pl.BlockSpec((1, C,  N),  lambda b, t: (b, 0, 0)),   # V (per-batch resident)
                pl.BlockSpec((1, C,  TQ), lambda b, t: (b, 0, t)),   # x residual tile (f32)
                pl.BlockSpec(memory_space=pltpu.MemorySpace.SMEM),   # gamma (scalar)
            ],
            out_specs=pl.BlockSpec((1, C, TQ), lambda b, t: (b, 0, t)),
            scratch_shapes=[
                pltpu.VMEM((C, TQ), jnp.float32),   # acc (unnormalized PV)
                pltpu.VMEM((1, TQ), jnp.float32),   # running max
                pltpu.VMEM((1, TQ), jnp.float32),   # running sum
            ],
        ),
        compiler_params=pltpu.CompilerParams(
            dimension_semantics=("parallel", "parallel"),
            vmem_limit_bytes=vmem_limit,
        ),
    )(q, k, v, x_cn, gamma1)

    return out_cn.reshape(B, C, H, W)


def pam_reference(x_nchw, wq, bq, wk, bk, wv, bv, gamma):
    """Plain-JAX reference mirroring the PyTorch forward exactly."""
    B, C, H, W = x_nchw.shape
    N = H * W
    x_flat_cn = x_nchw.reshape(B, C, N)                               # (B, C, N)
    q = jnp.einsum('oc,bcn->bon', wq, x_flat_cn) + bq[None, :, None]  # (B, C8, N)
    k = jnp.einsum('oc,bcn->bon', wk, x_flat_cn) + bk[None, :, None]  # (B, C8, N)
    v = jnp.einsum('oc,bcn->bon', wv, x_flat_cn) + bv[None, :, None]  # (B, C,  N)
    energy = jnp.einsum('bci,bcj->bij', q, k)                         # (B, N, N)
    attn = jax.nn.softmax(energy, axis=-1)
    out = jnp.einsum('bcj,bij->bci', v, attn)                         # (B, C, N)
    out = out.reshape(B, C, H, W)
    return gamma * out + x_nchw


if __name__ == "__main__":
    # Small shapes consistent with the module (in_dim >= 8 so in_dim // 8 > 0).
    B, C, H, W = 2, 16, 16, 16
    C8 = C // 8

    key = jax.random.PRNGKey(0)
    kx, kq, kbq, kk, kbk, kv, kbv = jax.random.split(key, 7)

    x = jax.random.normal(kx, (B, C, H, W), dtype=jnp.float32)
    wq = jax.random.normal(kq,  (C8, C), dtype=jnp.float32) * 0.1
    bq = jax.random.normal(kbq, (C8,),   dtype=jnp.float32) * 0.1
    wk = jax.random.normal(kk,  (C8, C), dtype=jnp.float32) * 0.1
    bk = jax.random.normal(kbk, (C8,),   dtype=jnp.float32) * 0.1
    wv = jax.random.normal(kv,  (C, C),  dtype=jnp.float32) * 0.1
    bv = jax.random.normal(kbv, (C,),    dtype=jnp.float32) * 0.1
    gamma = jnp.float32(0.5)   # module inits gamma to 0; nonzero to exercise attention

    ref = pam_reference(x, wq, bq, wk, bk, wv, bv, gamma)

    # f32 path, multiple query tiles and key chunks (N = 256 -> 2 tiles x 2 chunks).
    out_f32 = jax.block_until_ready(
        pam_module_forward(x, wq, bq, wk, bk, wv, bv, gamma,
                           q_tile=128, k_tile=128, compute_dtype=jnp.float32))
    assert out_f32.shape == (B, C, H, W)
    assert jnp.allclose(out_f32, ref, atol=2e-3, rtol=2e-3), "f32 mismatch"

    # Default path: bf16 MXU feed (f32 accumulation / softmax / residual), auto tiles.
    out_bf16 = jax.block_until_ready(
        pam_module_forward(x, wq, bq, wk, bk, wv, bv, gamma))
    assert jnp.allclose(out_bf16, ref, atol=5e-2, rtol=5e-2), "bf16 mismatch"

    print("KERNEL_OK")
</pallas_src>

<mosaic_0001>
module attributes {stable_mosaic.version = 11 : i64} {
  func.func @pam_kernel(%arg0: i32, %arg1: i32, %arg2: memref<1x2x128xf32, #tpu.memory_space<vmem>>, %arg3: memref<1x2x256xf32, #tpu.memory_space<vmem>>, %arg4: memref<1x16x256xf32, #tpu.memory_space<vmem>>, %arg5: memref<1x16x128xf32, #tpu.memory_space<vmem>>, %arg6: memref<1xf32, #tpu.memory_space<smem>>, %arg7: memref<1x16x128xf32, #tpu.memory_space<vmem>>, %arg8: memref<16x128xf32, #tpu.memory_space<vmem>>, %arg9: memref<1x128xf32, #tpu.memory_space<vmem>>, %arg10: memref<1x128xf32, #tpu.memory_space<vmem>>) attributes {dimension_semantics = [#tpu.dimension_semantics<parallel>, #tpu.dimension_semantics<parallel>], iteration_bounds = array<i64: 2, 2>, scalar_prefetch = 0 : i64, scratch_operands = 3 : i64, tpu.core_type = #tpu.core_type<tc>, window_params = [{transform_indices = @transform_0, window_bounds = array<i64: 1, 2, 128>}, {transform_indices = @transform_1, window_bounds = array<i64: 1, 2, 256>}, {transform_indices = @transform_2, window_bounds = array<i64: 1, 16, 256>}, {transform_indices = @transform_3, window_bounds = array<i64: 1, 16, 128>}, {transform_indices = @transform_4, window_bounds = array<i64: 1>}, {transform_indices = @transform_5, window_bounds = array<i64: 1, 16, 128>}]} {
    %c0 = arith.constant 0 : index
    %c0_0 = arith.constant 0 : index
    %c0_1 = arith.constant 0 : index
    %0 = vector.load %arg2[%c0, %c0_0, %c0_1] : memref<1x2x128xf32, #tpu.memory_space<vmem>>, vector<1x2x128xf32>
    %1 = vector.shape_cast %0 : vector<1x2x128xf32> to vector<2x128xf32>
    %cst = arith.constant 0xFF800000 : f32
    %2 = vector.broadcast %cst : f32 to vector<1x128xf32>
    %c0_2 = arith.constant 0 : index
    %c0_3 = arith.constant 0 : index
    %3 = vector.load %arg9[%c0_2, %c0_3] : memref<1x128xf32, #tpu.memory_space<vmem>>, vector<1x128xf32>
    tpu.vector_store %arg9[%c0_2, %c0_3], %2 {strides = array<i32>} : memref<1x128xf32, #tpu.memory_space<vmem>>, vector<1x128xf32>,
    %cst_4 = arith.constant 0.000000e+00 : f32
    %4 = vector.broadcast %cst_4 : f32 to vector<1x128xf32>
    %c0_5 = arith.constant 0 : index
    %c0_6 = arith.constant 0 : index
    %5 = vector.load %arg10[%c0_5, %c0_6] : memref<1x128xf32, #tpu.memory_space<vmem>>, vector<1x128xf32>
    tpu.vector_store %arg10[%c0_5, %c0_6], %4 {strides = array<i32>} : memref<1x128xf32, #tpu.memory_space<vmem>>, vector<1x128xf32>,
    %cst_7 = arith.constant 0.000000e+00 : f32
    %6 = vector.broadcast %cst_7 : f32 to vector<16x128xf32>
    %c0_8 = arith.constant 0 : index
    %c0_9 = arith.constant 0 : index
    %7 = vector.load %arg8[%c0_8, %c0_9] : memref<16x128xf32, #tpu.memory_space<vmem>>, vector<16x128xf32>
    tpu.vector_store %arg8[%c0_8, %c0_9], %6 {strides = array<i32>} : memref<16x128xf32, #tpu.memory_space<vmem>>, vector<16x128xf32>,
    %c0_i32 = arith.constant 0 : i32
    %c128_i32 = arith.constant 128 : i32
    %8 = arith.muli %c0_i32, %c128_i32 : i32
    %9 = tpu.assume_multiple %8, 128 : i32
    %c0_10 = arith.constant 0 : index
    %c0_11 = arith.constant 0 : index
    %10 = arith.index_cast %9 : i32 to index
    %11 = vector.load %arg3[%c0_10, %c0_11, %10] : memref<1x2x256xf32, #tpu.memory_space<vmem>>, vector<1x2x128xf32>
    %12 = vector.shape_cast %11 : vector<1x2x128xf32> to vector<2x128xf32>
    %c0_12 = arith.constant 0 : index
    %c0_13 = arith.constant 0 : index
    %13 = arith.index_cast %9 : i32 to index
    %14 = vector.load %arg4[%c0_12, %c0_13, %13] : memref<1x16x256xf32, #tpu.memory_space<vmem>>, vector<1x16x128xf32>
    %15 = vector.shape_cast %14 : vector<1x16x128xf32> to vector<16x128xf32>
    %cst_14 = arith.constant dense<0.000000e+00> : vector<128x128xf32>
    %16 = tpu.matmul %12, %1, %cst_14 {dimension_numbers = #tpu.dot_dimension_numbers<[0], [0], [1], [1], [0, 1, 1, 1], [], []>} : vector<2x128xf32>, vector<2x128xf32>, vector<128x128xf32> -> vector<128x128xf32>
    %c0_15 = arith.constant 0 : index
    %c0_16 = arith.constant 0 : index
    %17 = vector.load %arg9[%c0_15, %c0_16] : memref<1x128xf32, #tpu.memory_space<vmem>>, vector<1x128xf32>
    %cst_17 = arith.constant dense<0xFF800000> : vector<128xf32>
    %18 = vector.multi_reduction <maximumf>, %16, %cst_17 [0] : vector<128x128xf32> to vector<128xf32>
    %19 = vector.shape_cast %18 : vector<128xf32> to vector<1x128xf32>
    %20 = arith.maximumf %17, %19 : vector<1x128xf32>
    %21 = arith.subf %17, %20 : vector<1x128xf32>
    %22 = math.exp %21 : vector<1x128xf32>
    %23 = vector.broadcast %20 : vector<1x128xf32> to vector<128x128xf32>
    %24 = arith.subf %16, %23 : vector<128x128xf32>
    %25 = math.exp %24 : vector<128x128xf32>
    %c0_18 = arith.constant 0 : index
    %c0_19 = arith.constant 0 : index
    %26 = vector.load %arg10[%c0_18, %c0_19] : memref<1x128xf32, #tpu.memory_space<vmem>>, vector<1x128xf32>
    %27 = arith.mulf %22, %26 : vector<1x128xf32>
    %cst_20 = arith.constant dense<0.000000e+00> : vector<128xf32>
    %28 = vector.multi_reduction <add>, %25, %cst_20 [0] : vector<128x128xf32> to vector<128xf32>
    %29 = vector.shape_cast %28 : vector<128xf32> to vector<1x128xf32>
    %30 = arith.addf %27, %29 : vector<1x128xf32>
    %c0_21 = arith.constant 0 : index
    %c0_22 = arith.constant 0 : index
    %31 = vector.load %arg10[%c0_21, %c0_22] : memref<1x128xf32, #tpu.memory_space<vmem>>, vector<1x128xf32>
    tpu.vector_store %arg10[%c0_21, %c0_22], %30 {strides = array<i32>} : memref<1x128xf32, #tpu.memory_space<vmem>>, vector<1x128xf32>,
    %c0_23 = arith.constant 0 : index
    %c0_24 = arith.constant 0 : index
    %32 = vector.load %arg8[%c0_23, %c0_24] : memref<16x128xf32, #tpu.memory_space<vmem>>, vector<16x128xf32>
    %33 = vector.broadcast %22 : vector<1x128xf32> to vector<16x128xf32>
    %34 = arith.mulf %33, %32 : vector<16x128xf32>
    %cst_25 = arith.constant dense<0.000000e+00> : vector<16x128xf32>
    %35 = tpu.matmul %15, %25, %cst_25 {dimension_numbers = #tpu.dot_dimension_numbers<[1], [0], [0], [1], [0, 0, 1, 1], [], []>} : vector<16x128xf32>, vector<128x128xf32>, vector<16x128xf32> -> vector<16x128xf32>
    %36 = arith.addf %34, %35 : vector<16x128xf32>
    %c0_26 = arith.constant 0 : index
    %c0_27 = arith.constant 0 : index
    %37 = vector.load %arg8[%c0_26, %c0_27] : memref<16x128xf32, #tpu.memory_space<vmem>>, vector<16x128xf32>
    tpu.vector_store %arg8[%c0_26, %c0_27], %36 {strides = array<i32>} : memref<16x128xf32, #tpu.memory_space<vmem>>, vector<16x128xf32>,
    %c0_28 = arith.constant 0 : index
    %c0_29 = arith.constant 0 : index
    %38 = vector.load %arg9[%c0_28, %c0_29] : memref<1x128xf32, #tpu.memory_space<vmem>>, vector<1x128xf32>
    tpu.vector_store %arg9[%c0_28, %c0_29], %20 {strides = array<i32>} : memref<1x128xf32, #tpu.memory_space<vmem>>, vector<1x128xf32>,
    %c1_i32 = arith.constant 1 : i32
    %c128_i32_30 = arith.constant 128 : i32
    %39 = arith.muli %c1_i32, %c128_i32_30 : i32
    %40 = tpu.assume_multiple %39, 128 : i32
    %c0_31 = arith.constant 0 : index
    %c0_32 = arith.constant 0 : index
    %41 = arith.index_cast %40 : i32 to index
    %42 = vector.load %arg3[%c0_31, %c0_32, %41] : memref<1x2x256xf32, #tpu.memory_space<vmem>>, vector<1x2x128xf32>
    %43 = vector.shape_cast %42 : vector<1x2x128xf32> to vector<2x128xf32>
    %c0_33 = arith.constant 0 : index
    %c0_34 = arith.constant 0 : index
    %44 = arith.index_cast %40 : i32 to index
    %45 = vector.load %arg4[%c0_33, %c0_34, %44] : memref<1x16x256xf32, #tpu.memory_space<vmem>>, vector<1x16x128xf32>
    %46 = vector.shape_cast %45 : vector<1x16x128xf32> to vector<16x128xf32>
    %cst_35 = arith.constant dense<0.000000e+00> : vector<128x128xf32>
    %47 = tpu.matmul %43, %1, %cst_35 {dimension_numbers = #tpu.dot_dimension_numbers<[0], [0], [1], [1], [0, 1, 1, 1], [], []>} : vector<2x128xf32>, vector<2x128xf32>, vector<128x128xf32> -> vector<128x128xf32>
    %c0_36 = arith.constant 0 : index
    %c0_37 = arith.constant 0 : index
    %48 = vector.load %arg9[%c0_36, %c0_37] : memref<1x128xf32, #tpu.memory_space<vmem>>, vector<1x128xf32>
    %cst_38 = arith.constant dense<0xFF800000> : vector<128xf32>
    %49 = vector.multi_reduction <maximumf>, %47, %cst_38 [0] : vector<128x128xf32> to vector<128xf32>
    %50 = vector.shape_cast %49 : vector<128xf32> to vector<1x128xf32>
    %51 = arith.maximumf %48, %50 : vector<1x128xf32>
    %52 = arith.subf %48, %51 : vector<1x128xf32>
    %53 = math.exp %52 : vector<1x128xf32>
    %54 = vector.broadcast %51 : vector<1x128xf32> to vector<128x128xf32>
    %55 = arith.subf %47, %54 : vector<128x128xf32>
    %56 = math.exp %55 : vector<128x128xf32>
    %c0_39 = arith.constant 0 : index
    %c0_40 = arith.constant 0 : index
    %57 = vector.load %arg10[%c0_39, %c0_40] : memref<1x128xf32, #tpu.memory_space<vmem>>, vector<1x128xf32>
    %58 = arith.mulf %53, %57 : vector<1x128xf32>
    %cst_41 = arith.constant dense<0.000000e+00> : vector<128xf32>
    %59 = vector.multi_reduction <add>, %56, %cst_41 [0] : vector<128x128xf32> to vector<128xf32>
    %60 = vector.shape_cast %59 : vector<128xf32> to vector<1x128xf32>
    %61 = arith.addf %58, %60 : vector<1x128xf32>
    %c0_42 = arith.constant 0 : index
    %c0_43 = arith.constant 0 : index
    %62 = vector.load %arg10[%c0_42, %c0_43] : memref<1x128xf32, #tpu.memory_space<vmem>>, vector<1x128xf32>
    tpu.vector_store %arg10[%c0_42, %c0_43], %61 {strides = array<i32>} : memref<1x128xf32, #tpu.memory_space<vmem>>, vector<1x128xf32>,
    %c0_44 = arith.constant 0 : index
    %c0_45 = arith.constant 0 : index
    %63 = vector.load %arg8[%c0_44, %c0_45] : memref<16x128xf32, #tpu.memory_space<vmem>>, vector<16x128xf32>
    %64 = vector.broadcast %53 : vector<1x128xf32> to vector<16x128xf32>
    %65 = arith.mulf %64, %63 : vector<16x128xf32>
    %cst_46 = arith.constant dense<0.000000e+00> : vector<16x128xf32>
    %66 = tpu.matmul %46, %56, %cst_46 {dimension_numbers = #tpu.dot_dimension_numbers<[1], [0], [0], [1], [0, 0, 1, 1], [], []>} : vector<16x128xf32>, vector<128x128xf32>, vector<16x128xf32> -> vector<16x128xf32>
    %67 = arith.addf %65, %66 : vector<16x128xf32>
    %c0_47 = arith.constant 0 : index
    %c0_48 = arith.constant 0 : index
    %68 = vector.load %arg8[%c0_47, %c0_48] : memref<16x128xf32, #tpu.memory_space<vmem>>, vector<16x128xf32>
    tpu.vector_store %arg8[%c0_47, %c0_48], %67 {strides = array<i32>} : memref<16x128xf32, #tpu.memory_space<vmem>>, vector<16x128xf32>,
    %c0_49 = arith.constant 0 : index
    %c0_50 = arith.constant 0 : index
    %69 = vector.load %arg9[%c0_49, %c0_50] : memref<1x128xf32, #tpu.memory_space<vmem>>, vector<1x128xf32>
    tpu.vector_store %arg9[%c0_49, %c0_50], %51 {strides = array<i32>} : memref<1x128xf32, #tpu.memory_space<vmem>>, vector<1x128xf32>,
    %c2_i32 = arith.constant 2 : i32
    %c0_51 = arith.constant 0 : index
    %70 = memref.load %arg6[%c0_51] : memref<1xf32, #tpu.memory_space<smem>>
    %c0_52 = arith.constant 0 : index
    %c0_53 = arith.constant 0 : index
    %71 = vector.load %arg10[%c0_52, %c0_53] : memref<1x128xf32, #tpu.memory_space<vmem>>, vector<1x128xf32>
    %72 = tpu.reciprocal %71 : vector<1x128xf32> -> vector<1x128xf32>
    %73 = vector.broadcast %70 : f32 to vector<1x128xf32>
    %74 = arith.mulf %73, %72 : vector<1x128xf32>
    %c0_54 = arith.constant 0 : index
    %c0_55 = arith.constant 0 : index
    %75 = vector.load %arg8[%c0_54, %c0_55] : memref<16x128xf32, #tpu.memory_space<vmem>>, vector<16x128xf32>
    %76 = vector.broadcast %74 : vector<1x128xf32> to vector<16x128xf32>
    %77 = arith.mulf %75, %76 : vector<16x128xf32>
    %c0_56 = arith.constant 0 : index
    %c0_57 = arith.constant 0 : index
    %c0_58 = arith.constant 0 : index
    %78 = vector.load %arg5[%c0_56, %c0_57, %c0_58] : memref<1x16x128xf32, #tpu.memory_space<vmem>>, vector<1x16x128xf32>
    %79 = vector.shape_cast %78 : vector<1x16x128xf32> to vector<16x128xf32>
    %80 = arith.addf %77, %79 : vector<16x128xf32>
    %c0_59 = arith.constant 0 : index
    %c0_60 = arith.constant 0 : index
    %c0_61 = arith.constant 0 : index
    %81 = vector.load %arg7[%c0_59, %c0_60, %c0_61] : memref<1x16x128xf32, #tpu.memory_space<vmem>>, vector<1x16x128xf32>
    %82 = vector.shape_cast %81 : vector<1x16x128xf32> to vector<16x128xf32>
    %83 = vector.shape_cast %80 : vector<16x128xf32> to vector<1x16x128xf32>
    tpu.vector_store %arg7[%c0_59, %c0_60, %c0_61], %83 {strides = array<i32>} : memref<1x16x128xf32, #tpu.memory_space<vmem>>, vector<1x16x128xf32>,
    return
  }
  func.func @transform_0(%arg0: i32, %arg1: i32) -> (i32, i32, i32) {
    %c0_i32 = arith.constant 0 : i32
    %c0_i32_0 = arith.constant 0 : i32
    return %arg0, %c0_i32, %arg1 : i32, i32, i32
  }
  func.func @transform_1(%arg0: i32, %arg1: i32) -> (i32, i32, i32) {
    %c0_i32 = arith.constant 0 : i32
    %c0_i32_0 = arith.constant 0 : i32
    %c0_i32_1 = arith.constant 0 : i32
    return %arg0, %c0_i32, %c0_i32_0 : i32, i32, i32
  }
  func.func @transform_2(%arg0: i32, %arg1: i32) -> (i32, i32, i32) {
    %c0_i32 = arith.constant 0 : i32
    %c0_i32_0 = arith.constant 0 : i32
    %c0_i32_1 = arith.constant 0 : i32
    return %arg0, %c0_i32, %c0_i32_0 : i32, i32, i32
  }
  func.func @transform_3(%arg0: i32, %arg1: i32) -> (i32, i32, i32) {
    %c0_i32 = arith.constant 0 : i32
    %c0_i32_0 = arith.constant 0 : i32
    return %arg0, %c0_i32, %arg1 : i32, i32, i32
  }
  func.func @transform_4(%arg0: i32, %arg1: i32) -> i32 {
    %c0_i32 = arith.constant 0 : i32
    %c0_i32_0 = arith.constant 0 : i32
    return %c0_i32 : i32
  }
  func.func @transform_5(%arg0: i32, %arg1: i32) -> (i32, i32, i32) {
    %c0_i32 = arith.constant 0 : i32
    %c0_i32_0 = arith.constant 0 : i32
    return %arg0, %c0_i32, %arg1 : i32, i32, i32
  }
}

</mosaic_0001>

<bundles_post_ra>
// kernel: tpu_custom_call.1
= control target key start
LH: loop header
LB: loop body
LE: loop exit
PB: predicated region body
PF: predicated region fallthrough
CT: control target
= control target key end

     0   :  { %s2835_s0 = inlined_call_operand.hbm [shape: f32[2,2,256], index: 0, kind: input, shape index: {}]   ;;  %s2836_s1 = inlined_call_operand.hbm [shape: f32[2,2,256], index: 1, kind: input, shape index: {}]   ;;  %s2837_s2 = inlined_call_operand.hbm [shape: f32[2,16,256], index: 2, kind: input, shape index: {}]   ;;  %s2838_s3 = inlined_call_operand.hbm [shape: f32[2,16,256], index: 3, kind: input, shape index: {}]   ;;  %s2839_s4 = inlined_call_operand.<no memory space> [shape: f32[1], index: 4, kind: input, shape index: {}]   ;;  %s2840_s5 = inlined_call_operand.hbm [shape: f32[2,16,256], index: 5, kind: output, shape index: {}]  }
   0x1   :  { %2858 = sst [smem:[#allocation27_spill]] %s2835_s0 }
   0x2   :  { %2859 = sst [smem:[#allocation28_spill]] %s2836_s1 }
   0x3   :  { %2860 = sst [smem:[#allocation29_spill]] %s2840_s5 }
   0x4   :  { %10 = sst [smem:[#allocation5]] %s2839_s4 }
   0x5   :  { %11 = vsyncpa [#allocation7], 0 }
   0x6   :  { %13 = vsyncpa [#allocation7 + $0x1], 0 }
   0x7   :  { %14 = vsyncpa [#allocation10], 0 }
   0x8   :  { %16 = vsyncpa [#allocation10 + $0x1], 0 }
   0x9   :  { %17 = vsyncpa [#allocation13], 0 }
   0xa   :  { %19 = vsyncpa [#allocation13 + $0x1], 0 }
   0xb   :  { %20 = vsyncpa [#allocation8], 0 }
   0xc   :  { %22 = vsyncpa [#allocation8 + $0x1], 0  ;;  %s2244_s20 = smov 0   ;;  %s2246_s21 = smov 0  }
   0xd   :  { %s2248_s22 = smov 0   ;;  %s2250_s23 = smov 0  }
   0xe   :  { %s2252_s24 = smov 0   ;;  %s2254_s25 = smov 0  }
   0xf   :  { %s2256_s4 = smov 0   ;;  %s2258_s26 = smov 0  }
  0x10   :  { %s2260_s27 = smov 0   ;;  %s2262_s28 = smov 0  }
  0x11   :  { %s2264_s29 = smov 0  }
  0x12 LB: > { %2861 = sst [smem:[#allocation19_spill]] %s2159_s21  ;;  %s2298_s30 = sadd.s32 4294967295, %s2195_s29   ;;  %s2195_s29 = sphi %s2264_s29, %s28_s29   ;;  %s2191_s28 = sphi %s2262_s28, %s2912_s28   ;;  %s2187_s27 = sphi %s2260_s27, %s2911_s27   ;;  %s2183_s26 = sphi %s2258_s26, %s2910_s26   ;;  %s2179_s4 = sphi %s2256_s4, %s2909_s4   ;;  %s2175_s25 = sphi %s2254_s25, %s2908_s25   ;;  %s2171_s24 = sphi %s2252_s24, %s2907_s24   ;;  %s2167_s23 = sphi %s2250_s23, %s2906_s23   ;;  %s2163_s22 = sphi %s2248_s22, %s2905_s22   ;;  %s2159_s21 = sphi %s2246_s21, %s2904_s21   ;;  %s2155_s20 = sphi %s2244_s20, %s2901_s20  }
  0x13   : > { %2862 = sst [smem:[#allocation20_spill]] %s2167_s23  ;;  %p2843_p0 = scmp.eq.s32.totalorder %s2195_s29, 0 }
  0x14   : > { %2863 = sst [smem:[#allocation21_spill]] %s2179_s4  ;;  %p2842_p1 = scmp.eq.s32.totalorder %s2298_s30, 0 }
  0x15   : > { %2864 = sst [smem:[#allocation22_spill]] %s2183_s26  ;;  %p82_p2 = scmp.ne.s32.totalorder %s2163_s22, %s2159_s21 }
  0x16   : > { %p88_p3 = scmp.ne.s32.totalorder %s2159_s21, %s2155_s20  ;;  %p2841_p4 = scmp.lt.s32.totalorder %s2195_s29, 4 }
  0x17   : > { %p84_p5 = por %p82_p2, %p2843_p0  ;;  %s238_s8 = sand.u32 1, %s2195_s29  }
  0x18   : > { %p2311_p6 = por %p88_p3, %p2842_p1  ;;  %s240_s9 = sand.u32 1, %s2163_s22  }
  0x19   : > { %s1434_s10 = sshll.u32 %s240_s9, 2  ;;  %s1491_s11 = sshll.u32 %s2191_s28, 6 }
  0x1a   : > { %s2865_s7 = scalar_select %p2311_p6, 1, 0 }
  0x1b   : > { %s2867_s1 = sld [smem:[#allocation28_spill]]  ;;  %s242_s15 = scalar_lea.vmem [#allocation9], %s1434_s10 }
  0x1c   : > { %2866 = sst [smem:[#allocation23_spill]] %s2865_s7  ;;  %s250_s16 = sshll.u32 %s242_s15, 4  ;;  %s2323_s16 = int_to_ptr.vmem [resolvable:$true] %s250_s16 }
  0x1d   : > { %p2327_p7 = pnand %p2841_p4, %p84_p5  ;;  %s2331_s18 = sshll.u32 %s240_s9, 5 }
  0x1e   : > { %s2334_s19 = scalar_lea.sflag [#allocation10], %s238_s8 }
  0x1f   : > { %p2844_p10 = pneg %p2327_p7 }
  0x21   : > { %s2321_s14 = scalar_lea.hbm %s2867_s1, %s1491_s11  ;;  %s1950_s12 = scalar_lea.hbm %s2867_s1, 128 }
  0x22   : > { %s1945_s20 = scalar_lea.hbm %s2321_s14, 64  ;;  %p1951_p13 = scmp.lt.u32.totalorder %s2321_s14, %s2867_s1 }
  0x23   : > { %p1946_p9 = scmp.ne.s32.totalorder %s2321_s14, %s1945_s20  ;;  %p1952_p2 = scmp.lt.u32.totalorder %s1950_s12, %s1945_s20 }
  0x24   : > { %p1954_p5 = scmp.lt.u32.totalorder %s1945_s20, %s2321_s14 }
  0x25   : > { %p1948_p11 = pnand %p2844_p10, %p1946_p9  ;;  %p1953_p3 = por %p1952_p2, %p1951_p13 }
  0x27   : > { %p1949_p12 = pneg %p1948_p11  ;;  %p1955_p4 = por %p1954_p5, %p1953_p3 }
  0x29   : > { %p1956_p1 = pnand %p1955_p4, %p1949_p12 }
  0x2b   : > { %1959 = shalt.err (!%p1956_p1)
}
  0x2c   : > { %s1960_s8 = scalar_lea.vmem %s2323_s16, 64  ;;  %s2197_s9 = smov [#allocation9]  }
  0x2d   : > { %p1961_p9 = scmp.ne.s32.totalorder %s2323_s16, %s1960_s8  ;;  %s1965_s10 = sshll.u32 %s2197_s9, 4  ;;  %s1966_s10 = int_to_ptr.vmem [resolvable:$false] %s1965_s10 }
  0x2e   : > { %s1967_s11 = scalar_lea.vmem %s1966_s10, 128  ;;  %p1968_p8 = scmp.lt.s32.totalorder %s2323_s16, %s1966_s10 }
  0x2f   : > { %p1963_p11 = pnand %p1961_p9, %p2844_p10  ;;  %p1969_p13 = scmp.lt.s32.totalorder %s1967_s11, %s1960_s8 }
  0x31   : > { %p1964_p0 = pneg %p1963_p11  ;;  %p1970_p2 = por %p1969_p13, %p1968_p8 }
  0x33   : > { %p1971_p3 = pnand %p1970_p2, %p1964_p0 }
  0x35   : > { %1974 = shalt.err (!%p1971_p3)
}
  0x36   : > { %1765 = dma.hbm_to_vmem [thread:$0]  (!%p2327_p7), %s2321_s14, 64, %s2323_s16, %s2334_s19  }
  0x37   : > { %s261_s20 = scalar_lea.vmem [#allocation11], %s2331_s18  ;;  %p298_p0 = scmp.lt.s32.totalorder %s2195_s29, 5 }
  0x38   : > { %s268_s12 = sshll.u32 %s261_s20, 4  ;;  %p2869_p1 = scmp.ge.s32.totalorder %s2195_s29, 1  ;;  %s2364_s12 = int_to_ptr.vmem [resolvable:$true] %s268_s12 }
  0x39   : > { %s1428_s15 = sadd.s32 4294967294, %s2195_s29   ;;  %s37_s8 = sadd.s32 1, %s2187_s27 }
  0x3a   : > { %p2368_p4 = pnand %p2869_p1, %p298_p0  ;;  %p38_p8 = scmp.ge.s32.totalorder %s37_s8, 2 }
  0x3b   : > { %s40_s9 = sadd.s32 1, %s2191_s28  ;;  %s49_s14 = sadd.s32 1, %s2175_s25 }
  0x3c   : > { %s2870_s13 = scalar_select %p2368_p4, 1, 0 }
  0x3d   : > { %p56_p12 = scmp.ne.s32.totalorder %s2175_s25, %s2171_s24  ;;  %s2914_s8 = smov (%p38_p8, %s37_s8), 0 }
  0x3e   : > { %2871 = sst [smem:[#allocation24_spill]] %s2914_s8  ;;  %s2916_s9 = smov (!%p38_p8, %s40_s9), %s2191_s28 }
  0x3f   : > { %s45_s16 = ssub.s32 %s2187_s27, %s2914_s8  ;;  %p2872_p5 = scmp.eq.s32.totalorder %s2195_s29, 0 }
  0x40   : > { %p42_p11 = scmp.ge.s32.totalorder %s2916_s9, 2  ;;  %p62_p13 = scmp.ne.s32.totalorder %s2171_s24, %s2167_s23 }
  0x41   : > { %p2385_p9 = por %p2872_p5, %p56_p12  ;;  %p189_p2 = scmp.eq.s32.totalorder %s2298_s30, 3 }
  0x42   : > { %p195_p3 = scmp.eq.s32.totalorder %s1428_s15, 3  ;;  %s2918_s9 = smov (%p42_p11, %s2916_s9), 0 }
  0x43   : > { %2874 = sst [smem:[#allocation25_spill]] %s2918_s9  ;;  %p2875_p0 = scmp.eq.s32.totalorder %s2298_s30, 0 }
  0x44   : > { %p2400_p8 = por %p189_p2, %p56_p12  ;;  %s44_s20 = ssub.s32 %s2191_s28, %s2918_s9 }
  0x45   : > { %p2396_p1 = por %p2875_p0, %p62_p13  ;;  %p2406_p5 = por %p195_p3, %p62_p13 }
  0x46   : > { %s2877_s11 = scalar_select %p2400_p8, 1, 0 }
  0x47   : > { %s2876_s10 = scalar_select %p2396_p1, 1, 0 }
  0x48   : > { %2878 = sst [smem:[#allocation26_spill]] %s2877_s11  ;;  %s46_s15 = sor.u32 %s45_s16, %s44_s20 }
  0x49   : > { %s2879_s6 = scalar_select %p2406_p5, 1, 0 }
  0x4a   : > { %p73_p11 = scmp.eq.s32.totalorder %s44_s20, 0  ;;  %p47_p10 = scmp.eq.s32.totalorder %s46_s15, 0 }
  0x4b   : > { %s2411_s1 = sand.u32 1, %s2175_s25   ;;  %s2880_s8 = sadd.s32 1, %s2163_s22 }
  0x4c   : > { %s2416_s23 = scalar_select %p73_p11, %s2163_s22, %s2880_s8  }
  0x4d   : > { %s2419_s5 = scalar_select %p47_p10, %s2175_s25, %s49_s14  }
  0x4e   : > { %s1431_s9 = sshll.u32 %s2411_s1, 1  ;;  %s1432_s11 = sshll.u32 %s2191_s28, 1 }
  0x4f   : > { %s227_s4 = sadd.s32 %s2187_s27, %s1432_s11  ;;  %s222_s26 = scalar_lea.vmem [#allocation6], %s1431_s9 }
  0x50   : > { %s231_s7 = sshll.u32 %s222_s26, 4  ;;  %s1433_s21 = sshll.u32 %s227_s4, 5  ;;  %s2424_s7 = int_to_ptr.vmem [resolvable:$true] %s231_s7 }
  0x51   : > { %s2881_s0 = sld [smem:[#allocation27_spill]]  ;;  %p2882_p12 = scmp.lt.s32.totalorder %s2195_s29, 4 }
  0x52   : > { %s219_s26 = scalar_lea.sflag [#allocation7], %s2411_s1 }
  0x53   : > { %p2435_p10 = pnand %p2882_p12, %p2385_p9 }
  0x55   : > { %p2857_p2 = pneg %p2435_p10 }
  0x57   : > { %s2429_s15 = scalar_lea.hbm %s2881_s0, %s1433_s21  ;;  %s1980_s18 = scalar_lea.hbm %s2881_s0, 128 }
  0x58   : > { %s1975_s9 = scalar_lea.hbm %s2429_s15, 32  ;;  %p1981_p9 = scmp.lt.u32.totalorder %s2429_s15, %s2881_s0 }
  0x59   : > { %p1976_p13 = scmp.ne.s32.totalorder %s2429_s15, %s1975_s9  ;;  %p1982_p11 = scmp.lt.u32.totalorder %s1980_s18, %s1975_s9 }
  0x5a   : > { %p1984_p5 = scmp.lt.u32.totalorder %s1975_s9, %s2429_s15 }
  0x5b   : > { %p1978_p3 = pnand %p2857_p2, %p1976_p13  ;;  %p1983_p12 = por %p1982_p11, %p1981_p9 }
  0x5d   : > { %p1979_p0 = pneg %p1978_p3  ;;  %p1985_p8 = por %p1984_p5, %p1983_p12 }
  0x5f   : > { %p1986_p6 = pnand %p1985_p8, %p1979_p0 }
  0x61   : > { %1989 = shalt.err (!%p1986_p6)
}
  0x62   : > { %s1990_s20 = scalar_lea.vmem %s2424_s7, 32  ;;  %s2198_s21 = smov [#allocation6]  }
  0x63   : > { %p1991_p13 = scmp.ne.s32.totalorder %s2424_s7, %s1990_s20  ;;  %s1995_s14 = sshll.u32 %s2198_s21, 4  ;;  %s1996_s14 = int_to_ptr.vmem [resolvable:$false] %s1995_s14 }
  0x64   : > { %s1997_s11 = scalar_lea.vmem %s1996_s14, 64  ;;  %p1998_p4 = scmp.lt.s32.totalorder %s2424_s7, %s1996_s14 }
  0x65   : > { %p1993_p3 = pnand %p1991_p13, %p2857_p2  ;;  %p1999_p9 = scmp.lt.s32.totalorder %s1997_s11, %s1990_s20 }
  0x67   : > { %p1994_p1 = pneg %p1993_p3  ;;  %p2000_p11 = por %p1999_p9, %p1998_p4 }
  0x69   : > { %p2001_p5 = pnand %p2000_p11, %p1994_p1 }
  0x6b   : > { %2004 = shalt.err (!%p2001_p5)
}
  0x6c   : > { %1762 = dma.hbm_to_vmem [thread:$0]  (!%p2435_p10), %s2429_s15, 32, %s2424_s7, %s219_s26  }
  0x6d   : > { %s1441_s9 = sshll.u32 %s2191_s28, 2  ;;  %s1492_s18 = sshll.u32 %s2191_s28, 9 }
  0x6e   : > { %s2469_s16 = sadd.s32 %s2187_s27, %s1441_s9  ;;  %s2474_s20 = scalar_lea.hbm %s2837_s2, %s1492_s18 }
  0x6f   : > { %s2005_s14 = scalar_lea.hbm %s2474_s20, 512  ;;  %p2884_p4 = pneg %p2327_p7 }
  0x70   : > { %p2006_p6 = scmp.ne.s32.totalorder %s2474_s20, %s2005_s14  ;;  %s2010_s26 = scalar_lea.hbm %s2837_s2, 1024 }
  0x71   : > { %p2011_p0 = scmp.lt.u32.totalorder %s2474_s20, %s2837_s2  ;;  %p2012_p12 = scmp.lt.u32.totalorder %s2010_s26, %s2005_s14 }
  0x72   : > { %p2008_p1 = pnand %p2006_p6, %p2884_p4  ;;  %p2014_p3 = scmp.lt.u32.totalorder %s2005_s14, %s2474_s20 }
  0x73   : > { %p2013_p13 = por %p2012_p12, %p2011_p0 }
  0x74   : > { %p2009_p8 = pneg %p2008_p1 }
  0x75   : > { %p2015_p9 = por %p2014_p3, %p2013_p13 }
  0x77   : > { %p2016_p11 = pnand %p2015_p9, %p2009_p8 }
  0x79   : > { %2019 = shalt.err (!%p2016_p11)
}
  0x7a   : > { %s2020_s4 = scalar_lea.vmem %s2364_s12, 512  ;;  %p2885_p6 = pmov %p2884_p4 }
  0x7b   : > { %p2021_p5 = scmp.ne.s32.totalorder %s2364_s12, %s2020_s4  ;;  %s2199_s18 = smov [#allocation11]  }
  0x7c   : > { %s2025_s21 = sshll.u32 %s2199_s18, 4  ;;  %s2026_s21 = int_to_ptr.vmem [resolvable:$false] %s2025_s21 }
  0x7d   : > { %p2023_p4 = pnand %p2021_p5, %p2885_p6  ;;  %s2027_s7 = scalar_lea.vmem %s2026_s21, 1024 }
  0x7e   : > { %p2028_p2 = scmp.lt.s32.totalorder %s2364_s12, %s2026_s21  ;;  %p2029_p0 = scmp.lt.s32.totalorder %s2027_s7, %s2020_s4 }
  0x7f   : > { %p2024_p1 = pneg %p2023_p4 }
  0x80   : > { %p2030_p12 = por %p2029_p0, %p2028_p2 }
  0x82   : > { %p2031_p13 = pnand %p2030_p12, %p2024_p1 }
  0x84   : > { %2034 = shalt.err (!%p2031_p13)
}
  0x85   : > { %s2200_s14 = smov 256   ;;  %s2201_s15 = smov 16  }
  0x86   : > { %1768 = dma.hbm_to_vmem [thread:$0]  (!%p2327_p7), %s2474_s20, 512, %s2364_s12, %s2334_s19, %s2200_s14, %s2200_s14, %s2201_s15  }
  0x87   : > { %s1442_s26 = sshll.u32 %s2469_s16, 7  ;;  %s2886_s11 = sshll.u32 %s2411_s1, 4 }
  0x88   : > { %s282_s9 = scalar_lea.vmem [#allocation12], %s2886_s11  ;;  %s2508_s7 = scalar_lea.hbm %s2838_s3, %s1442_s26 }
  0x89   : > { %s290_s4 = sshll.u32 %s282_s9, 4  ;;  %s279_s0 = scalar_lea.sflag [#allocation13], %s2411_s1  ;;  %s2510_s4 = int_to_ptr.vmem [resolvable:$true] %s290_s4 }
  0x8a   : > { %s2035_s17 = scalar_lea.hbm %s2508_s7, 256  ;;  %p2887_p7 = pneg %p2435_p10 }
  0x8b   : > { %p2036_p2 = scmp.ne.s32.totalorder %s2508_s7, %s2035_s17  ;;  %s2040_s16 = scalar_lea.hbm %s2838_s3, 1024 }
  0x8c   : > { %p2041_p9 = scmp.lt.u32.totalorder %s2508_s7, %s2838_s3  ;;  %p2042_p11 = scmp.lt.u32.totalorder %s2040_s16, %s2035_s17 }
  0x8d   : > { %p2038_p8 = pnand %p2036_p2, %p2887_p7  ;;  %p2044_p6 = scmp.lt.u32.totalorder %s2035_s17, %s2508_s7 }
  0x8e   : > { %p2043_p5 = por %p2042_p11, %p2041_p9 }
  0x8f   : > { %p2039_p3 = pneg %p2038_p8 }
  0x90   : > { %p2045_p4 = por %p2044_p6, %p2043_p5 }
  0x92   : > { %p2046_p1 = pnand %p2045_p4, %p2039_p3 }
  0x94   : > { %2049 = shalt.err (!%p2046_p1)
}
  0x95   : > { %s2050_s26 = scalar_lea.vmem %s2510_s4, 256  ;;  %p2888_p12 = pmov %p2887_p7 }
  0x96   : > { %p2051_p0 = scmp.ne.s32.totalorder %s2510_s4, %s2050_s26  ;;  %s2202_s11 = smov [#allocation12]  }
  0x97   : > { %s2055_s9 = sshll.u32 %s2202_s11, 4  ;;  %s2056_s9 = int_to_ptr.vmem [resolvable:$false] %s2055_s9 }
  0x98   : > { %p2053_p13 = pnand %p2051_p0, %p2888_p12  ;;  %s2057_s18 = scalar_lea.vmem %s2056_s9, 512 }
  0x99   : > { %p2058_p7 = scmp.lt.s32.totalorder %s2510_s4, %s2056_s9  ;;  %p2059_p8 = scmp.lt.s32.totalorder %s2057_s18, %s2050_s26 }
  0x9a   : > { %p2054_p2 = pneg %p2053_p13 }
  0x9b   : > { %p2060_p9 = por %p2059_p8, %p2058_p7 }
  0x9d   : > { %p2061_p11 = pnand %p2060_p9, %p2054_p2 }
  0x9f   : > { %2064 = shalt.err (!%p2061_p11)
}
  0xa0   : > { %s2203_s21 = smov 128   ;;  %s2204_s17 = smov 8  }
  0xa1   : > { %1771 = dma.hbm_to_vmem [thread:$0]  (!%p2435_p10), %s2508_s7, 256, %s2510_s4, %s279_s0, %s2200_s14, %s2203_s21, %s2204_s17  }
  0xa2   : > { %p2889_p3 = scmp.ne.s32.totalorder %s2870_s13, 0 }
  0xa3   : > { %s2542_s19 = sand.u32 (!%p2889_p3), 1, %s2171_s24   ;;  %p2890_p5 = scmp.ne.s32.totalorder (!%p2889_p3), %s2876_s10, 0 }
  0xa4   : > { %302 = sbr.rel (%p2889_p3) target bundleno = 962 (0x3c2), region = 40  ;;  %s1444_s12 = sshll.u32 (!%p2889_p3), %s2542_s19, 1 }
  0xa5   : > { %s305_s16 = scalar_lea.sflag (!%p2889_p3), [#allocation7], %s2542_s19  ;;  %s308_s20 = scalar_lea.vmem (!%p2889_p3), [#allocation6], %s1444_s12 }
  0xab   : > { %2138 = dma.done.wait (%p2890_p5), %s305_s16, 32  }
  0xac   : > { %2140 = vsyncadd (%p2890_p5), %s305_s16, 4294967264  ;;  %s2891_s1 = sld [smem:[#allocation19_spill]]  ;;  %s2892_s0 = sld [smem:[#allocation23_spill]] }
  0xad   : > { %s313_s8 = sand.u32 1, %s2298_s30  }
  0xae   : > { %s314_s4 = scalar_lea.sflag [#allocation10], %s313_s8 }
  0xb2   : > { %s315_s13 = sand.u32 1, %s2891_s1   ;;  %p2893_p10 = scmp.ne.s32.totalorder %s2892_s0, 0 }
  0xb3   : > { %s1445_s14 = sshll.u32 %s315_s13, 2 }
  0xb4   : > { %s317_s7 = scalar_lea.vmem [#allocation9], %s1445_s14 }
  0xb5   : > { %2142 = dma.done.wait (%p2893_p10), %s314_s4, 576  }
  0xb6   : > { %2144 = vsyncadd (%p2893_p10), %s314_s4, 4294966720  ;;  %s1446_s15 = sshll.u32 %s315_s13, 5  ;;  %s1447_s26 = sshll.u32 %s2542_s19, 4 }
  0xb7   : > { %s2557_s11 = scalar_lea.vmem [#allocation11], %s1446_s15  ;;  %s332_s9 = scalar_lea.sflag [#allocation13], %s2542_s19 }
  0xb8   : > { %s2562_s30 = scalar_lea.vmem [#allocation12], %s1447_s26 }
  0xb9   : > { %2146 = dma.done.wait (%p2890_p5), %s332_s9, 256  }
  0xba   : > { %2148 = vsyncadd (%p2890_p5), %s332_s9, 4294967040  ;;  %v382_v0 = vld [vmem:[%s317_s7] sm:$0x3]  ;;  %v377_v1 = vld [vmem:[%s308_s20] sm:$0x3]  ;;  %vm466_vm0 = vcmask 1041408  }
  0xbb   : > { %385 = vxpose.xlu0.b32.start.end [1/1] (short) %v382_v0, 128  ;;  %1563 = vmatprep.subr.msk.mxu0 %vm466_vm0, %v377_v1  ;;  %v1466_v2 = vld [vmem:[%s317_s7 + $0x2] sm:$0x3]  ;;  %vm417_vm1 = vcmask 15360   ;;  %v2205_v35 = vmov -inf   ;;  %v2206_v36 = vmov 0.0   ;;  %v383_v42 = vld [vmem:[%s2557_s11] sm:$0xff] }
  0xbc   : > { %1564 = vmatpush3.msk.msra.mxu0 %vm466_vm0, %v377_v1  ;;  %378 = vst [vmem:[#allocation3] sm:$0x1] %v2205_v35  ;;  %379 = vst [vmem:[#allocation4] sm:$0x1] %v2206_v36  ;;  %1621 = vmatprep.mubr.f32.mxu1 %v383_v42  ;;  %s2894_s10 = sld [smem:[#allocation22_spill]]  ;;  %s2895_s18 = sld [smem:[#allocation21_spill]] }
  0xbd   : > { %1624 = vmatprep.subr.msk.mxu0 %vm466_vm0, %v377_v1  ;;  %s1235_s21 = sld [smem:[#allocation5]]  ;;  %s376_s16 = scalar_lea.vmem [#allocation14], %s1447_s26 }
  0xbe   : > { %s1271_s20 = sshll.u32 %s376_s16, 4  ;;  %s2896_s1 = sld [smem:[#allocation26_spill]]  ;;  %s2767_s20 = int_to_ptr.vmem [resolvable:$true] %s1271_s20 }
  0xbf   : > { %s2897_s14 = sld [smem:[#allocation29_spill]]  ;;  %s1257_s7 = scalar_lea.sflag [#allocation8], %s2542_s19 }
  0xc0   : > { %s2065_s15 = scalar_lea.vmem %s2767_s20, 256  ;;  %s2207_s26 = smov [#allocation14]  }
  0xc1   : > { %p2066_p6 = scmp.ne.s32.totalorder %s2767_s20, %s2065_s15 }
  0xc2   : > { %s1487_s17 = sshll.u32 %s2894_s10, 2 }
  0xc3   : > { %s1268_s12 = sadd.s32 %s2895_s18, %s1487_s17 }
  0xc4   : > { %s1488_s0 = sshll.u32 %s1268_s12, 7  ;;  %p2898_p4 = scmp.ne.s32.totalorder %s2896_s1, 0 }
  0xc5   : > { %s2772_s4 = scalar_lea.hbm %s2897_s14, %s1488_s0 }
  0xc6   : > { %p2067_p1 = pnand %p2066_p6, %p2898_p4 }
  0xc8   : > { %p2068_p0 = pneg %p2067_p1 }
  0xf8   : > { %815 = vxpose.xlu0.b32.start.end [1/1] (short) %v1466_v2, 128 }
 0x13b   : > { %v401_v3 = vpop.trf.xlu0 }
 0x13c   : > { %1565 = vmatprep.mubr.msk.f32.mxu0 %vm417_vm1, %v401_v3 }
 0x13f   : > { %v402_v4 = vpop.trf.xlu0 }
 0x140   : > { %1566 = vmatmul.mubr.msk.f32.vlgmr.msra.gmra.mrb[0].mxu0 %vm417_vm1, %v402_v4 }
 0x141   : > { %1625 = vmatpush3.msk.msra.mxu0 %vm466_vm0, %v377_v1 }
 0x143   : > { %v403_v5 = vpop.trf.xlu0 }
 0x144   : > { %1568 = vmatprep.mubr.msk.f32.mxu0 %vm417_vm1, %v403_v5 }
 0x147   : > { %v404_v6 = vpop.trf.xlu0 }
 0x148   : > { %1569 = vmatmul.mubr.msk.f32.gmra.mrb[2].mxu0 %vm417_vm1, %v404_v6 }
 0x14b   : > { %v405_v7 = vpop.trf.xlu0 }
 0x14c   : > { %1571 = vmatprep.mubr.msk.f32.mxu0 %vm417_vm1, %v405_v7 }
 0x14f   : > { %v406_v8 = vpop.trf.xlu0 }
 0x150   : > { %1572 = vmatmul.mubr.msk.f32.gmra.mrb[4].mxu0 %vm417_vm1, %v406_v8 }
 0x153   : > { %v407_v9 = vpop.trf.xlu0 }
 0x154   : > { %1574 = vmatprep.mubr.msk.f32.mxu0 %vm417_vm1, %v407_v9  ;;  %v642_v9 = vlaneseq }
 0x157   : > { %v408_v10 = vpop.trf.xlu0 }
 0x158   : > { %1575 = vmatmul.mubr.msk.f32.gmra.mrb[6].mxu0 %vm417_vm1, %v408_v10 }
 0x15b   : > { %v409_v11 = vpop.trf.xlu0 }
 0x15c   : > { %1577 = vmatprep.mubr.msk.f32.mxu0 %vm417_vm1, %v409_v11 }
 0x15f   : > { %v410_v12 = vpop.trf.xlu0 }
 0x160   : > { %1578 = vmatmul.mubr.msk.f32.gmra.mrb[8].mxu0 %vm417_vm1, %v410_v12  ;;  %v643_v12 = vshrl.u32 %v642_v9, 7 }
 0x163   : > { %v411_v13 = vpop.trf.xlu0 }
 0x164   : > { %1580 = vmatprep.mubr.msk.f32.mxu0 %vm417_vm1, %v411_v13 }
 0x167   : > { %v412_v14 = vpop.trf.xlu0 }
 0x168   : > { %1581 = vmatmul.mubr.msk.f32.gmra.mrb[10].mxu0 %vm417_vm1, %v412_v14 }
 0x16b   : > { %v413_v15 = vpop.trf.xlu0 }
 0x16c   : > { %1583 = vmatprep.mubr.msk.f32.mxu0 %vm417_vm1, %v413_v15  ;;  %v2652_v15 = vld [vmem:[#allocation3] sm:$0x1] }
 0x16f   : > { %v414_v16 = vpop.trf.xlu0 }
 0x170   : > { %1584 = vmatmul.mubr.msk.f32.gmra.mrb[12].mxu0 %vm417_vm1, %v414_v16 }
 0x173   : > { %v415_v17 = vpop.trf.xlu0 }
 0x174   : > { %1586 = vmatprep.mubr.msk.f32.mxu0 %vm417_vm1, %v415_v17 }
 0x177   : > { %v416_v18 = vpop.trf.xlu0 }
 0x178   : > { %1587 = vmatmul.mubr.msk.f32.gmra.mrb[14].mxu0 %vm417_vm1, %v416_v18  ;;  %v2656_v18 = vsub.s32 0, %v643_v12 }
 0x17b   : > { %v831_v19 = vpop.trf.xlu0 }
 0x17c   : > { %1626 = vmatprep.mubr.msk.f32.mxu0 %vm417_vm1, %v831_v19 }
 0x17f   : > { %v832_v20 = vpop.trf.xlu0 }
 0x180   : > { %1627 = vmatmul.mubr.msk.f32.vlgmr.msra.gmra.mrb[16].mxu0 %vm417_vm1, %v832_v20 }
 0x183   : > { %v833_v21 = vpop.trf.xlu0 }
 0x184   : > { %1629 = vmatprep.mubr.msk.f32.mxu0 %vm417_vm1, %v833_v21 }
 0x187   : > { %v834_v22 = vpop.trf.xlu0 }
 0x188   : > { %1630 = vmatmul.mubr.msk.f32.gmra.mrb[18].mxu0 %vm417_vm1, %v834_v22 }
 0x18b   : > { %v835_v23 = vpop.trf.xlu0 }
 0x18c   : > { %1632 = vmatprep.mubr.msk.f32.mxu0 %vm417_vm1, %v835_v23 }
 0x18f   : > { %v836_v24 = vpop.trf.xlu0 }
 0x190   : > { %1633 = vmatmul.mubr.msk.f32.gmra.mrb[20].mxu0 %vm417_vm1, %v836_v24 }
 0x193   : > { %v837_v25 = vpop.trf.xlu0 }
 0x194   : > { %1635 = vmatprep.mubr.msk.f32.mxu0 %vm417_vm1, %v837_v25 }
 0x197   : > { %v838_v26 = vpop.trf.xlu0 }
 0x198   : > { %1636 = vmatmul.mubr.msk.f32.gmra.mrb[22].mxu0 %vm417_vm1, %v838_v26 }
 0x19b   : > { %v839_v27 = vpop.trf.xlu0 }
 0x19c   : > { %1638 = vmatprep.mubr.msk.f32.mxu0 %vm417_vm1, %v839_v27 }
 0x19f   : > { %v840_v28 = vpop.trf.xlu0 }
 0x1a0   : > { %1639 = vmatmul.mubr.msk.f32.gmra.mrb[24].mxu0 %vm417_vm1, %v840_v28 }
 0x1a3   : > { %v841_v29 = vpop.trf.xlu0 }
 0x1a4   : > { %1641 = vmatprep.mubr.msk.f32.mxu0 %vm417_vm1, %v841_v29 }
 0x1a7   : > { %v842_v30 = vpop.trf.xlu0 }
 0x1a8   : > { %1642 = vmatmul.mubr.msk.f32.gmra.mrb[26].mxu0 %vm417_vm1, %v842_v30 }
 0x1ab   : > { %v843_v31 = vpop.trf.xlu0 }
 0x1ac   : > { %1644 = vmatprep.mubr.msk.f32.mxu0 %vm417_vm1, %v843_v31 }
 0x1af   : > { %v844_v32 = vpop.trf.xlu0 }
 0x1b0   : > { %1645 = vmatmul.mubr.msk.f32.gmra.mrb[28].mxu0 %vm417_vm1, %v844_v32 }
 0x1b3   : > { %v845_v33 = vpop.trf.xlu0 }
 0x1b4   : > { %1647 = vmatprep.mubr.msk.f32.mxu0 %vm417_vm1, %v845_v33 }
 0x1b7   : > { %v846_v34 = vpop.trf.xlu0 }
 0x1b8   : > { %1648 = vmatmul.mubr.msk.f32.gmra.mrb[30].mxu0 %vm417_vm1, %v846_v34 }
 0x213   : > { %v2600_v37 = vpop.f32.mrb[0].mxu0 }
 0x214   : > { %v2602_v38 = vpop.f32.mrb[1].mxu0 }
 0x21b   : > { %v2604_v39 = vpop.f32.mrb[2].mxu0 }
 0x21c   : > { %v2606_v40 = vpop.f32.mrb[3].mxu0 }
 0x223   : > { %v2608_v41 = vpop.f32.mrb[4].mxu0 }
 0x224   : > { %v617_v43 = vmax.f32 %v2600_v37, %v2608_v41  ;;  %v2613_v44 = vpop.f32.mrb[5].mxu0 }
 0x225   : > { %v616_v45 = vmax.f32 %v2602_v38, %v2613_v44 }
 0x22b   : > { %v2617_v46 = vpop.f32.mrb[6].mxu0 }
 0x22c   : > { %v619_v47 = vmax.f32 %v2604_v39, %v2617_v46  ;;  %v2621_v48 = vpop.f32.mrb[7].mxu0 }
 0x22d   : > { %v618_v49 = vmax.f32 %v2606_v40, %v2621_v48 }
 0x233   : > { %v2625_v50 = vpop.f32.mrb[8].mxu0 }
 0x234   : > { %v621_v51 = vmax.f32 %v617_v43, %v2625_v50  ;;  %v2628_v52 = vpop.f32.mrb[9].mxu0 }
 0x235   : > { %v620_v53 = vmax.f32 %v616_v45, %v2628_v52 }
 0x23b   : > { %v2631_v54 = vpop.f32.mrb[10].mxu0 }
 0x23c   : > { %v623_v55 = vmax.f32 %v619_v47, %v2631_v54  ;;  %v2634_v56 = vpop.f32.mrb[11].mxu0 }
 0x23d   : > { %v622_v57 = vmax.f32 %v618_v49, %v2634_v56 }
 0x243   : > { %v2637_v58 = vpop.f32.mrb[12].mxu0 }
 0x244   : > { %v625_v59 = vmax.f32 %v621_v51, %v2637_v58  ;;  %v2640_v60 = vpop.f32.mrb[13].mxu0 }
 0x245   : > { %v624_v61 = vmax.f32 %v620_v53, %v2640_v60 }
 0x247   : > { %v628_v62 = vmax.f32 %v624_v61, %v625_v59 }
 0x24b   : > { %v2643_v63 = vpop.f32.mrb[14].mxu0 }
 0x24c   : > { %v627_v0 = vmax.f32 %v623_v55, %v2643_v63  ;;  %v606_v1 = vpop.f32.mrb[15].mxu0 }
 0x24d   : > { %v626_v2 = vmax.f32 %v622_v57, %v606_v1 }
 0x24f   : > { %v629_v3 = vmax.f32 %v626_v2, %v627_v0 }
 0x251   : > { %v630_v4 = vmax.f32 %v628_v62, %v629_v3 }
 0x253   : > { %v631_v5 = vrot.slane %v630_v4, 4  ;;  %v2646_v6 = vpop.f32.mrb[16].mxu0 }
 0x254   : > { %v2648_v7 = vpop.f32.mrb[17].mxu0 }
 0x255   : > { %v632_v8 = vmax.f32 %v630_v4, %v631_v5 }
 0x257   : > { %v633_v10 = vrot.slane %v632_v8, 2 }
 0x259   : > { %v634_v11 = vmax.f32 %v632_v8, %v633_v10 }
 0x25b   : > { %v635_v13 = vrot.slane %v634_v11, 1  ;;  %v2650_v14 = vpop.f32.mrb[18].mxu0 }
 0x25c   : > { %v2654_v16 = vpop.f32.mrb[19].mxu0 }
 0x25d   : > { %v636_v17 = vmax.f32 %v634_v11, %v635_v13 }
 0x25f   : > { %v2659_v19 = vmax.f32 %v2652_v15, %v636_v17 }
 0x261   : > { %v645_v20 = vrot.slane %v2659_v19, %v2656_v18  ;;  %809 = vst [vmem:[#allocation3] sm:$0x1] %v2659_v19 }
 0x263   : > { %v661_v21 = vsub.f32 %v606_v1, %v645_v20  ;;  %v2664_v22 = vpop.f32.mrb[20].mxu0  ;;  %v647_v23 = vsub.f32 %v2602_v38, %v645_v20  ;;  %v648_v24 = vsub.f32 %v2600_v37, %v645_v20  ;;  %v649_v25 = vsub.f32 %v2606_v40, %v645_v20 }
 0x264   : > { %v1042_v26 = vmax.f32 %v2646_v6, %v2664_v22  ;;  %v2671_v27 = vpop.f32.mrb[21].mxu0  ;;  %v650_v28 = vsub.f32 %v2604_v39, %v645_v20  ;;  %v651_v29 = vsub.f32 %v2613_v44, %v645_v20  ;;  %v652_v30 = vsub.f32 %v2608_v41, %v645_v20 }
 0x265   : > { %v691_v31 = vmul.f32 1.442695, %v661_v21  ;;  %v1041_v32 = vmax.f32 %v2648_v7, %v2671_v27  ;;  %v653_v33 = vsub.f32 %v2621_v48, %v645_v20  ;;  %v654_v34 = vsub.f32 %v2617_v46, %v645_v20 }
 0x266   : > { %v655_v35 = vsub.f32 %v2628_v52, %v645_v20  ;;  %v656_v36 = vsub.f32 %v2625_v50, %v645_v20  ;;  %v657_v37 = vsub.f32 %v2634_v56, %v645_v20  ;;  %v658_v38 = vsub.f32 %v2631_v54, %v645_v20 }
 0x267   : > { %1875 = vpow2.f32 %v691_v31  ;;  %v659_v39 = vsub.f32 %v2640_v60, %v645_v20  ;;  %v660_v40 = vsub.f32 %v2637_v58, %v645_v20  ;;  %v663_v41 = vmul.f32 1.442695, %v647_v23 }
 0x268   : > { %v665_v42 = vmul.f32 1.442695, %v648_v24  ;;  %v667_v43 = vmul.f32 1.442695, %v649_v25  ;;  %v669_v44 = vmul.f32 1.442695, %v650_v28  ;;  %v662_v45 = vsub.f32 %v2643_v63, %v645_v20 }
 0x269   : > { %1877 = vpow2.f32 %v663_v41  ;;  %v671_v46 = vmul.f32 1.442695, %v651_v29  ;;  %v673_v47 = vmul.f32 1.442695, %v652_v30  ;;  %v675_v49 = vmul.f32 1.442695, %v653_v33 }
 0x26a   : > { %1879 = vpow2.f32 %v665_v42  ;;  %v677_v52 = vmul.f32 1.442695, %v654_v34  ;;  %v679_v54 = vmul.f32 1.442695, %v655_v35  ;;  %v681_v55 = vmul.f32 1.442695, %v656_v36 }
 0x26b   : > { %v2687_v48 = vpop.f32.mrb[22].mxu0  ;;  %1881 = vpow2.f32 %v667_v43  ;;  %v683_v56 = vmul.f32 1.442695, %v657_v37  ;;  %v685_v57 = vmul.f32 1.442695, %v658_v38 }
 0x26c   : > { %v1044_v50 = vmax.f32 %v2650_v14, %v2687_v48  ;;  %v2691_v51 = vpop.f32.mrb[23].mxu0  ;;  %1883 = vpow2.f32 %v669_v44  ;;  %v687_v59 = vmul.f32 1.442695, %v659_v39  ;;  %v689_v60 = vmul.f32 1.442695, %v660_v40 }
 0x26d   : > { %v1043_v53 = vmax.f32 %v2654_v16, %v2691_v51  ;;  %1885 = vpow2.f32 %v671_v46  ;;  %v693_v63 = vmul.f32 1.442695, %v662_v45 }
 0x26e   : > { %1887 = vpow2.f32 %v673_v47 }
 0x26f   : > { %1889 = vpow2.f32 %v675_v49 }
 0x270   : > { %1891 = vpow2.f32 %v677_v52 }
 0x271   : > { %v2695_v58 = vpop.eup %1875  ;;  %1893 = vpow2.f32 %v679_v54 }
 0x272   : > { %1895 = vpow2.f32 %v681_v55  ;;  %v638_v55 = vsub.f32 %v2652_v15, %v2659_v19 }
 0x273   : > { %v1878_v61 = vpop.eup %1877  ;;  %v2697_v62 = vpop.f32.mrb[24].mxu0  ;;  %1897 = vpow2.f32 %v683_v56 }
 0x274   : > { %v1880_v0 = vpop.eup %1879  ;;  %v1046_v1 = vmax.f32 %v1042_v26, %v2697_v62  ;;  %1899 = vpow2.f32 %v685_v57  ;;  %v2700_v2 = vpop.f32.mrb[25].mxu0 }
 0x275   : > { %v1882_v3 = vpop.eup %1881  ;;  %1901 = vpow2.f32 %v687_v59  ;;  %v697_v4 = vadd.f32 %v1880_v0, %v1878_v61  ;;  %v1685_v5 = vpack.c.bf16 %v1880_v0, %v1878_v61  ;;  %v1045_v8 = vmax.f32 %v1041_v32, %v2700_v2 }
 0x276   : > { %v1884_v9 = vpop.eup %1883  ;;  %1903 = vpow2.f32 %v689_v60 }
 0x277   : > { %v1886_v10 = vpop.eup %1885  ;;  %v698_v11 = vadd.f32 %v1882_v3, %v697_v4  ;;  %1686 = vmatprep.subr.bf16.mxu1 %v1685_v5  ;;  %v1689_v12 = vpack.c.bf16 %v1884_v9, %v1882_v3  ;;  %1905 = vpow2.f32 %v693_v63  ;;  %v639_v63 = vmul.f32 1.442695, %v638_v55 }
 0x278   : > { %v1888_v13 = vpop.eup %1887  ;;  %1688 = vmatpush3.bf16.msra.mxu1 %v1685_v5 }
 0x279   : > { %v1890_v17 = vpop.eup %1889  ;;  %v699_v20 = vadd.f32 %v1884_v9, %v698_v11  ;;  %1690 = vmatprep.subr.bf16.mxu1 %v1689_v12  ;;  %v1693_v21 = vpack.c.bf16 %v1888_v13, %v1886_v10  ;;  %1907 = vpow2.f32 %v639_v63  ;;  %v384_v9 = vld [vmem:[%s2557_s11 + $0x10] sm:$0xff] }
 0x27a   : > { %v1892_v23 = vpop.eup %1891 }
 0x27b   : > { %v1894_v24 = vpop.eup %1893  ;;  %v700_v25 = vadd.f32 %v1886_v10, %v699_v20  ;;  %v2703_v26 = vpop.f32.mrb[26].mxu0  ;;  %v1697_v28 = vpack.c.bf16 %v1892_v23, %v1890_v17 }
 0x27c   : > { %v1896_v29 = vpop.eup %1895  ;;  %1692 = vmatpush3.bf16.msra.mxu1 %v1689_v12  ;;  %v1048_v30 = vmax.f32 %v1044_v50, %v2703_v26  ;;  %v2706_v31 = vpop.f32.mrb[27].mxu0  ;;  %v1467_v12 = vld [vmem:[%s2557_s11 + $0x8] sm:$0xff] }
 0x27d   : > { %v1898_v32 = vpop.eup %1897  ;;  %v701_v33 = vadd.f32 %v1888_v13, %v700_v25  ;;  %1694 = vmatprep.subr.bf16.mxu1 %v1693_v21  ;;  %v1047_v34 = vmax.f32 %v1043_v53, %v2706_v31  ;;  %v1701_v35 = vpack.c.bf16 %v1896_v29, %v1894_v24 }
 0x27e   : > { %v1900_v36 = vpop.eup %1899 }
 0x27f   : > { %v1902_v37 = vpop.eup %1901  ;;  %v702_v38 = vadd.f32 %v1890_v17, %v701_v33  ;;  %v1705_v39 = vpack.c.bf16 %v1900_v36, %v1898_v32 }
 0x280   : > { %v1904_v40 = vpop.eup %1903  ;;  %1696 = vmatpush3.bf16.msra.mxu1 %v1693_v21 }
 0x281   : > { %v1906_v41 = vpop.eup %1905  ;;  %v703_v42 = vadd.f32 %v1892_v23, %v702_v38  ;;  %1698 = vmatprep.subr.bf16.mxu1 %v1697_v28  ;;  %v1709_v43 = vpack.c.bf16 %v1904_v40, %v1902_v37  ;;  %v695_v23 = vld [vmem:[#allocation4] sm:$0x1] }
 0x282   : > { %v1713_v44 = vpack.c.bf16 %v1906_v41, %v2695_v58 }
 0x283   : > { %v704_v45 = vadd.f32 %v1894_v24, %v703_v42  ;;  %v2710_v46 = vpop.f32.mrb[28].mxu0 }
 0x284   : > { %1700 = vmatpush3.bf16.msra.mxu1 %v1697_v28  ;;  %v1050_v47 = vmax.f32 %v1046_v1, %v2710_v46  ;;  %v2713_v49 = vpop.f32.mrb[29].mxu0 }
 0x285   : > { %v705_v50 = vadd.f32 %v1896_v29, %v704_v45  ;;  %1702 = vmatprep.subr.bf16.mxu1 %v1701_v35  ;;  %v1049_v52 = vmax.f32 %v1045_v8, %v2713_v49 }
 0x287   : > { %v706_v53 = vadd.f32 %v1898_v32, %v705_v50  ;;  %v1053_v54 = vmax.f32 %v1049_v52, %v1050_v47  ;;  %v2730_v32 = vld [vmem:[#allocation3] sm:$0x1] }
 0x288   : > { %1704 = vmatpush3.bf16.msra.mxu1 %v1701_v35 }
 0x289   : > { %v707_v56 = vadd.f32 %v1900_v36, %v706_v53  ;;  %1706 = vmatprep.subr.bf16.mxu1 %v1705_v39 }
 0x28b   : > { %v708_v57 = vadd.f32 %v1902_v37, %v707_v56  ;;  %v2718_v59 = vpop.f32.mrb[30].mxu0 }
 0x28c   : > { %1708 = vmatpush3.bf16.msra.mxu1 %v1705_v39  ;;  %v1052_v60 = vmax.f32 %v1048_v30, %v2718_v59  ;;  %v2721_v61 = vpop.f32.mrb[31].mxu0 }
 0x28d   : > { %v709_v0 = vadd.f32 %v1904_v40, %v708_v57  ;;  %1710 = vmatprep.subr.bf16.mxu1 %v1709_v43  ;;  %v1051_v1 = vmax.f32 %v1047_v34, %v2721_v61 }
 0x28f   : > { %v710_v3 = vadd.f32 %v2695_v58, %v709_v0  ;;  %v1054_v15 = vmax.f32 %v1051_v1, %v1052_v60  ;;  %v2727_v58 = vpop.eup %1907 }
 0x290   : > { %1712 = vmatpush3.bf16.msra.mxu1 %v1709_v43  ;;  %v696_v30 = vmul.f32 %v2727_v58, %v695_v23 }
 0x291   : > { %v1055_v19 = vmax.f32 %v1053_v54, %v1054_v15  ;;  %v711_v4 = vadd.f32 %v1906_v41, %v710_v3  ;;  %1714 = vmatprep.subr.bf16.mxu1 %v1713_v44 }
 0x293   : > { %v1056_v5 = vrot.slane %v1055_v19, 4  ;;  %v712_v8 = vrot.slane %v711_v4, 4 }
 0x294   : > { %1716 = vmatpush3.bf16.msra.mxu1 %v1713_v44 }
 0x295   : > { %v1057_v10 = vmax.f32 %v1055_v19, %v1056_v5  ;;  %v713_v11 = vadd.f32 %v712_v8, %v711_v4 }
 0x297   : > { %v1058_v13 = vrot.slane %v1057_v10, 2  ;;  %v714_v17 = vrot.slane %v713_v11, 2  ;;  %1622 = vmatmul.mubr.f32.vlgmr.msra.gmra.mrb[0].mxu1 %v384_v9 }
 0x298   : > { %1682 = vmatprep.mubr.f32.mxu1 %v1467_v12 }
 0x299   : > { %v1059_v20 = vmax.f32 %v1057_v10, %v1058_v13  ;;  %v715_v21 = vadd.f32 %v714_v17, %v713_v11 }
 0x29b   : > { %v1060_v24 = vrot.slane %v1059_v20, 1  ;;  %v716_v25 = vrot.slane %v715_v21, 1 }
 0x29d   : > { %v1061_v28 = vmax.f32 %v1059_v20, %v1060_v24  ;;  %v717_v29 = vadd.f32 %v716_v25, %v715_v21 }
 0x29f   : > { %v2733_v33 = vmax.f32 %v2730_v32, %v1061_v28  ;;  %v718_v34 = vadd.f32 %v717_v29, %v696_v30 }
 0x2a1   : > { %v1070_v35 = vrot.slane %v2733_v33, %v2656_v18  ;;  %1234 = vst [vmem:[#allocation3] sm:$0x1] %v2733_v33  ;;  %719 = vst [vmem:[#allocation4] sm:$0x1] %v718_v34 }
 0x2a3   : > { %v1072_v36 = vsub.f32 %v2648_v7, %v1070_v35  ;;  %v1073_v37 = vsub.f32 %v2646_v6, %v1070_v35  ;;  %v1074_v38 = vsub.f32 %v2654_v16, %v1070_v35  ;;  %v1075_v39 = vsub.f32 %v2650_v14, %v1070_v35 }
 0x2a4   : > { %v1076_v40 = vsub.f32 %v2671_v27, %v1070_v35  ;;  %v1077_v41 = vsub.f32 %v2664_v22, %v1070_v35  ;;  %v1078_v42 = vsub.f32 %v2691_v51, %v1070_v35  ;;  %v1079_v43 = vsub.f32 %v2687_v48, %v1070_v35 }
 0x2a5   : > { %v1080_v44 = vsub.f32 %v2700_v2, %v1070_v35  ;;  %v1081_v45 = vsub.f32 %v2697_v62, %v1070_v35  ;;  %v1082_v7 = vsub.f32 %v2706_v31, %v1070_v35  ;;  %v1083_v6 = vsub.f32 %v2703_v26, %v1070_v35 }
 0x2a6   : > { %v1084_v16 = vsub.f32 %v2713_v49, %v1070_v35  ;;  %v1085_v14 = vsub.f32 %v2710_v46, %v1070_v35  ;;  %v1086_v27 = vsub.f32 %v2721_v61, %v1070_v35  ;;  %v1087_v22 = vsub.f32 %v2718_v59, %v1070_v35 }
 0x2a7   : > { %v1088_v47 = vmul.f32 1.442695, %v1072_v36  ;;  %v1090_v51 = vmul.f32 1.442695, %v1073_v37  ;;  %v1092_v50 = vmul.f32 1.442695, %v1074_v38 }
 0x2a8   : > { %v1094_v48 = vmul.f32 1.442695, %v1075_v39  ;;  %v1096_v2 = vmul.f32 1.442695, %v1076_v40  ;;  %v1098_v62 = vmul.f32 1.442695, %v1077_v41 }
 0x2a9   : > { %1909 = vpow2.f32 %v1088_v47  ;;  %v1100_v31 = vmul.f32 1.442695, %v1078_v42  ;;  %v1102_v26 = vmul.f32 1.442695, %v1079_v43  ;;  %v1104_v49 = vmul.f32 1.442695, %v1080_v44 }
 0x2aa   : > { %1911 = vpow2.f32 %v1090_v51  ;;  %v1106_v46 = vmul.f32 1.442695, %v1081_v45  ;;  %v1108_v52 = vmul.f32 1.442695, %v1082_v7  ;;  %v1110_v53 = vmul.f32 1.442695, %v1083_v6 }
 0x2ab   : > { %1913 = vpow2.f32 %v1092_v50  ;;  %v1112_v54 = vmul.f32 1.442695, %v1084_v16  ;;  %v1114_v55 = vmul.f32 1.442695, %v1085_v14  ;;  %v1116_v57 = vmul.f32 1.442695, %v1086_v27 }
 0x2ac   : > { %1915 = vpow2.f32 %v1094_v48  ;;  %v1118_v60 = vmul.f32 1.442695, %v1087_v22  ;;  %v1063_v42 = vsub.f32 %v2730_v32, %v2733_v33  ;;  %v1468_v27 = vld [vmem:[%s2557_s11 + $0x18] sm:$0xff]  ;;  %v1120_v50 = vld [vmem:[#allocation4] sm:$0x1]  ;;  %s2069_s11 = sshll.u32 %s2207_s26, 4  ;;  %s2070_s11 = int_to_ptr.vmem [resolvable:$false] %s2069_s11 }
 0x2ad   : > { %1917 = vpow2.f32 %v1096_v2  ;;  %s2071_s9 = scalar_lea.vmem %s2070_s11, 512  ;;  %p2072_p12 = scmp.lt.s32.totalorder %s2767_s20, %s2070_s11 }
 0x2ae   : > { %1919 = vpow2.f32 %v1098_v62  ;;  %v1064_v45 = vmul.f32 1.442695, %v1063_v42  ;;  %p2073_p13 = scmp.lt.s32.totalorder %s2071_s9, %s2065_s15 }
 0x2af   : > { %1921 = vpow2.f32 %v1100_v31  ;;  %v726_v31 = vrot.slane %v2727_v58, %v2656_v18 }
 0x2b0   : > { %1923 = vpow2.f32 %v1102_v26  ;;  %p2074_p2 = por %p2073_p13, %p2072_p12 }
 0x2b1   : > { %1925 = vpow2.f32 %v1104_v49  ;;  %v728_v26 = vmul.f32 0.0, %v726_v31 }
 0x2b2   : > { %1927 = vpow2.f32 %v1106_v46  ;;  %p2075_p7 = pnand %p2074_p2, %p2068_p0 }
 0x2b3   : > { %v1910_v56 = vpop.eup %1909  ;;  %1929 = vpow2.f32 %v1108_v52 }
 0x2b4   : > { %v1912_v59 = vpop.eup %1911  ;;  %1931 = vpow2.f32 %v1110_v53 }
 0x2b5   : > { %v1914_v61 = vpop.eup %1913  ;;  %1933 = vpow2.f32 %v1112_v54  ;;  %v1122_v63 = vadd.f32 %v1912_v59, %v1910_v56  ;;  %v1717_v0 = vpack.c.bf16 %v1912_v59, %v1910_v56 }
 0x2b6   : > { %v1916_v1 = vpop.eup %1915  ;;  %1935 = vpow2.f32 %v1114_v55 }
 0x2b7   : > { %v1918_v3 = vpop.eup %1917  ;;  %1937 = vpow2.f32 %v1116_v57  ;;  %v1123_v15 = vadd.f32 %v1914_v61, %v1122_v63  ;;  %1718 = vmatprep.subr.bf16.mxu1 %v1717_v0  ;;  %v1721_v19 = vpack.c.bf16 %v1916_v1, %v1914_v61 }
 0x2b8   : > { %v1920_v4 = vpop.eup %1919  ;;  %1939 = vpow2.f32 %v1118_v60  ;;  %1720 = vmatpush3.bf16.msra.mxu1 %v1717_v0  ;;  %v1238_v60 = vstv %s1235_s21 }
 0x2b9   : > { %v1922_v5 = vpop.eup %1921  ;;  %v1124_v8 = vadd.f32 %v1916_v1, %v1123_v15  ;;  %1722 = vmatprep.subr.bf16.mxu1 %v1721_v19  ;;  %v1725_v9 = vpack.c.bf16 %v1920_v4, %v1918_v3  ;;  %1941 = vpow2.f32 %v1064_v45 }
 0x2ba   : > { %v1924_v10 = vpop.eup %1923 }
 0x2bb   : > { %v1926_v11 = vpop.eup %1925  ;;  %v1125_v12 = vadd.f32 %v1918_v3, %v1124_v8  ;;  %v1729_v13 = vpack.c.bf16 %v1924_v10, %v1922_v5  ;;  %v1251_v3 = vld [vmem:[%s2562_s30 + $0x8] sm:$0xff] }
 0x2bc   : > { %v1928_v17 = vpop.eup %1927  ;;  %1724 = vmatpush3.bf16.msra.mxu1 %v1721_v19 }
 0x2bd   : > { %v1930_v20 = vpop.eup %1929  ;;  %v1126_v21 = vadd.f32 %v1920_v4, %v1125_v12  ;;  %1726 = vmatprep.subr.bf16.mxu1 %v1725_v9  ;;  %v1733_v23 = vpack.c.bf16 %v1928_v17, %v1926_v11  ;;  %v1250_v4 = vld [vmem:[%s2562_s30] sm:$0xff] }
 0x2be   : > { %v1932_v24 = vpop.eup %1931 }
 0x2bf   : > { %v1934_v25 = vpop.eup %1933  ;;  %v1127_v28 = vadd.f32 %v1922_v5, %v1126_v21  ;;  %v1737_v29 = vpack.c.bf16 %v1932_v24, %v1930_v20 }
 0x2c0   : > { %v1936_v30 = vpop.eup %1935  ;;  %1728 = vmatpush3.bf16.msra.mxu1 %v1725_v9 }
 0x2c1   : > { %v1938_v34 = vpop.eup %1937  ;;  %v1128_v35 = vadd.f32 %v1924_v10, %v1127_v28  ;;  %1730 = vmatprep.subr.bf16.mxu1 %v1729_v13  ;;  %v1741_v36 = vpack.c.bf16 %v1936_v30, %v1934_v25 }
 0x2c2   : > { %v1940_v37 = vpop.eup %1939 }
 0x2c3   : > { %v1129_v38 = vadd.f32 %v1926_v11, %v1128_v35  ;;  %v1745_v39 = vpack.c.bf16 %v1940_v37, %v1938_v34  ;;  %v1942_v32 = vpop.eup %1941 }
 0x2c4   : > { %1732 = vmatpush3.bf16.msra.mxu1 %v1729_v13  ;;  %v1121_v2 = vmul.f32 %v1942_v32, %v1120_v50  ;;  %v1151_v53 = vrot.slane %v1942_v32, %v2656_v18 }
 0x2c5   : > { %v1130_v40 = vadd.f32 %v1928_v17, %v1129_v38  ;;  %1734 = vmatprep.subr.bf16.mxu1 %v1733_v23 }
 0x2c7   : > { %v1131_v41 = vadd.f32 %v1930_v20, %v1130_v40 }
 0x2c8   : > { %1736 = vmatpush3.bf16.msra.mxu1 %v1733_v23 }
 0x2c9   : > { %v1132_v43 = vadd.f32 %v1932_v24, %v1131_v41  ;;  %1738 = vmatprep.subr.bf16.mxu1 %v1737_v29 }
 0x2cb   : > { %v1133_v44 = vadd.f32 %v1934_v25, %v1132_v43 }
 0x2cc   : > { %1740 = vmatpush3.bf16.msra.mxu1 %v1737_v29 }
 0x2cd   : > { %v1134_v7 = vadd.f32 %v1936_v30, %v1133_v44  ;;  %1742 = vmatprep.subr.bf16.mxu1 %v1741_v36 }
 0x2cf   : > { %v1135_v6 = vadd.f32 %v1938_v34, %v1134_v7 }
 0x2d0   : > { %1744 = vmatpush3.bf16.msra.mxu1 %v1741_v36 }
 0x2d1   : > { %v1136_v16 = vadd.f32 %v1940_v37, %v1135_v6  ;;  %1746 = vmatprep.subr.bf16.mxu1 %v1745_v39 }
 0x2d3   : > { %v1137_v14 = vrot.slane %v1136_v16, 4 }
 0x2d4   : > { %1748 = vmatpush3.bf16.msra.mxu1 %v1745_v39 }
 0x2d5   : > { %v1138_v22 = vadd.f32 %v1137_v14, %v1136_v16 }
 0x2d7   : > { %v1139_v47 = vrot.slane %v1138_v22, 2  ;;  %1683 = vmatmul.mubr.f32.vlgmr.msra.gmra.mrb[2].mxu1 %v1468_v27 }
 0x2d9   : > { %v1140_v51 = vadd.f32 %v1139_v47, %v1138_v22 }
 0x2db   : > { %v1141_v33 = vrot.slane %v1140_v51, 1 }
 0x2dd   : > { %v1142_v48 = vadd.f32 %v1141_v33, %v1140_v51 }
 0x2df   : > { %v1143_v62 = vadd.f32 %v1142_v48, %v1121_v2 }
 0x2e1   : > { %1144 = vst [vmem:[#allocation4] sm:$0x1] %v1143_v62 }
 0x2e8   : > { %v1236_v57 = vld [vmem:[#allocation4] sm:$0x1] }
 0x2e9   : > { %1943 = vrcp.f32 %v1236_v57 }
 0x2f3   : > { %v1944_v59 = vpop.eup %1943 }
 0x2f4   : > { %v1239_v61 = vmul.f32 %v1944_v59, %v1238_v60 }
 0x2f6   : > { %v1246_v0 = vrot.slane %v1239_v61, %v2656_v18 }
 0x36a   : > { %v1623_v49 = vpop.f32.mrb[0].mxu1 }
 0x36b   : > { %v806_v46 = vadd.f32 %v1623_v49, %v728_v26  ;;  %v796_v52 = vpop.f32.mrb[1].mxu1 }
 0x36c   : > { %v805_v54 = vadd.f32 %v796_v52, %v728_v26 }
 0x36d   : > { %v1154_v55 = vmul.f32 %v1151_v53, %v806_v46 }
 0x36e   : > { %v1153_v56 = vmul.f32 %v1151_v53, %v805_v54 }
 0x3aa   : > { %v1684_v58 = vpop.f32.mrb[2].mxu1 }
 0x3ab   : > { %v1231_v63 = vadd.f32 %v1684_v58, %v1154_v55  ;;  %v1221_v1 = vpop.f32.mrb[3].mxu1 }
 0x3ac   : > { %v1230_v15 = vadd.f32 %v1221_v1, %v1153_v56 }
 0x3ad   : > { %v1249_v19 = vmul.f32 %v1246_v0, %v1231_v63 }
 0x3ae   : > { %v1248_v5 = vmul.f32 %v1246_v0, %v1230_v15 }
 0x3af   : > { %v1253_v8 = vadd.f32 %v1251_v3, %v1249_v19 }
 0x3b0   : > { %v1252_v9 = vadd.f32 %v1250_v4, %v1248_v5 }
 0x3b1   : > { %1255 = vst [vmem:[%s376_s16 + $0x8] sm:$0xff] %v1253_v8 }
 0x3b2   : > { %1254 = vst [vmem:[%s376_s16] sm:$0xff] %v1252_v9 }
 0x3b3   : > { %2078 = shalt.err (!%p2075_p7)
}
 0x3b4   : > { %s2079_s30 = scalar_lea.hbm %s2772_s4, 256  ;;  %s2083_s21 = scalar_lea.hbm %s2897_s14, 1024 }
 0x3b5   : > { %p2080_p8 = scmp.ne.s32.totalorder %s2772_s4, %s2079_s30  ;;  %p2084_p3 = scmp.lt.u32.totalorder %s2772_s4, %s2897_s14 }
 0x3b6   : > { %p2085_p5 = scmp.lt.u32.totalorder %s2083_s21, %s2079_s30  ;;  %p2087_p6 = scmp.lt.u32.totalorder %s2079_s30, %s2772_s4 }
 0x3b7   : > { %p2081_p9 = pnand %p2080_p8, %p2898_p4 }
 0x3b8   : > { %p2086_p10 = por %p2085_p5, %p2084_p3 }
 0x3b9   : > { %p2082_p11 = pneg %p2081_p9 }
 0x3ba   : > { %p2088_p1 = por %p2087_p6, %p2086_p10 }
 0x3bc   : > { %p2089_p0 = pnand %p2088_p1, %p2082_p11 }
 0x3be   : > { %2092 = shalt.err (!%p2089_p0)
}
 0x3bf   : > { %s2208_s16 = smov 128   ;;  %s2209_s0 = smov 256  }
 0x3c0   : > { %s2210_s8 = smov 8  }
 0x3c1   : > { %1757 = dma.vmem_to_hbm [thread:$0]  (%p2898_p4), %s2767_s20, 256, %s2772_s4, %s1257_s7, %s2208_s16, %s2209_s0, %s2210_s8  }
 0x3c2 PF: > { %s2899_s13 = sld [smem:[#allocation20_spill]]  ;;  %p1777_p12 = scmp.ge.s32.totalorder %s2195_s29, 2 }
 0x3c3   : > { %p2900_p13 = scmp.ne.s32.totalorder %s2879_s6, 0 }
 0x3c5   : > { %p1773_p2 = pnand %p1777_p12, %p2900_p13 }
 0x3c8   : > { %s1286_s15 = sand.u32 1, %s2899_s13  }
 0x3c9   : > { %s1287_s26 = scalar_lea.sflag [#allocation8], %s1286_s15 }
 0x3ca   : > { %2150 = dma.done.wait (!%p1773_p2), %s1287_s26, 256  }
 0x3cb   : > { %2152 = vsyncadd (!%p1773_p2), %s1287_s26, 4294967040  ;;  %s28_s29 = sadd.s32 1, %s2195_s29   ;;  %s2901_s20 = sld [smem:[#allocation19_spill]] }
 0x3cc   : > { %p25_p7 = scmp.ge.s32.totalorder %s28_s29, 6   ;;  %s2902_s19 = sld [smem:[#allocation24_spill]] }
 0x3cd   : > { %s2903_s1 = sld [smem:[#allocation25_spill]]  ;;  %s2904_s21 = smov %s2163_s22 }
 0x3ce   : > { %s2905_s22 = smov %s2416_s23  ;;  %s2906_s23 = smov %s2171_s24 }
 0x3cf   : > { %s2907_s24 = smov %s2175_s25  ;;  %s2908_s25 = smov %s2419_s5 }
 0x3d0   : > { %s2909_s4 = smov %s2187_s27  ;;  %s2910_s26 = smov %s2191_s28 }
 0x3d1   :  { %27 = sbr.rel (!%p25_p7) target bundleno = 18 (0x12), region = 124 }
 0x3d2   : > { %s2911_s27 = smov %s2902_s19 }
 0x3d3   : > { %s2912_s28 = smov %s2903_s1 }
 0x3d8   :  { %1292 = vsyncpa [#allocation7], 1 }
 0x3d9   :  { %1294 = vsyncpa [#allocation7 + $0x1], 1 }
 0x3da   :  { %1295 = vsyncpa [#allocation10], 1 }
 0x3db   :  { %1297 = vsyncpa [#allocation10 + $0x1], 1 }
 0x3dc   :  { %1298 = vsyncpa [#allocation13], 1 }
 0x3dd   :  { %1300 = vsyncpa [#allocation13 + $0x1], 1 }
 0x3de   :  { %1301 = vsyncpa [#allocation8], 1 }
 0x3df   :  { %1303 = vsyncpa [#allocation8 + $0x1], 1 }

</bundles_post_ra>
